<compile_context>
chip_gen: v7x
topology: tpu7x:2x2x1
jax: 0.10.0
libtpu: 0.0.40
codegen_flags: <defaults>
</compile_context>

<pallas_src>
import math

import jax
import jax.numpy as jnp
from jax.experimental import pallas as pl
from jax.experimental.pallas import tpu as pltpu

_SUBLANE = 8
_LANE = 128


def _sinusoidal_kernel(t_ref, const_ref, o_ref):
    t = t_ref[...]                    # (TB, 1)     f32
    inv_freq = const_ref[0:1, :]      # (1, d_pad)  f32
    phase = const_ref[1:2, :]         # (1, d_pad)  pi/2 at even i, 0 at odd i
    offset = const_ref[2:3, :]        # (1, d_pad)  1.0 at odd i, 0 at even i
    # sin(even*x) + cos(odd*x)  ==  sin(x + phase) + offset  (one EUP op/elem)
    o_ref[...] = jnp.sin(t * inv_freq + phase) + offset


def _pick_batch_tile(B, d_pad):
    """Largest multiple-of-8 row tile whose double-buffered output fits a
    conservative (v5e-safe) VMEM budget; small batches get >=2 grid steps."""
    budget_bytes = 4 * 1024 * 1024                      # safe on v5e/v6e/v7x
    bytes_per_row = 2 * d_pad * 4                       # double-buffered f32
    max_rows = max(_SUBLANE, (budget_bytes // bytes_per_row) // _SUBLANE * _SUBLANE)
    tile = min(max_rows, 512)
    b_pad_min = pl.cdiv(B, _SUBLANE) * _SUBLANE
    if b_pad_min <= tile:
        if b_pad_min > _SUBLANE:
            # split small batches into ~2 tiles so v7x's 2nd TC gets work
            tile = pl.cdiv(b_pad_min, 2 * _SUBLANE) * _SUBLANE
        else:
            tile = _SUBLANE
    return tile


def sinusoidal_position_embeddings(time, d, *, batch_tile=None):
    """time: (B,) f32 timesteps -> (B, d) f32 embeddings (matches the module)."""
    time = jnp.asarray(time, jnp.float32)
    (B,) = time.shape

    d_pad = pl.cdiv(d, _LANE) * _LANE
    if batch_tile is None:
        batch_tile = _pick_batch_tile(B, d_pad)
    b_pad = pl.cdiv(B, batch_tile) * batch_tile

    # Per-dimension constants, computed once outside the grid and packed into
    # a single sublane-padded (8, d_pad) array: row0=inv_freq, row1=phase,
    # row2=offset.  Padded lanes are zeroed -> sin(0)+0 = 0 in lane padding.
    i = jnp.arange(d_pad, dtype=jnp.float32)
    parity = jnp.mod(i, 2.0)                              # i % 2
    valid = (i < d).astype(jnp.float32)
    inv_freq = jnp.exp(-(math.log(10000.0) / d) * (i - parity)) * valid
    phase = (1.0 - parity) * valid * (math.pi / 2.0)      # cos(x)=sin(x+pi/2) at even i
    offset = parity * valid                               # cos(0)=1 at odd i
    consts = (jnp.zeros((_SUBLANE, d_pad), jnp.float32)
              .at[0].set(inv_freq).at[1].set(phase).at[2].set(offset))

    if b_pad == B:
        t2 = time.reshape(b_pad, 1)
    else:
        t2 = jnp.pad(time, (0, b_pad - B)).reshape(b_pad, 1)

    grid = (b_pad // batch_tile,)
    out = pl.pallas_call(
        _sinusoidal_kernel,
        out_shape=jax.ShapeDtypeStruct((b_pad, d_pad), jnp.float32),
        grid_spec=pltpu.PrefetchScalarGridSpec(
            num_scalar_prefetch=0,
            grid=grid,
            in_specs=[
                pl.BlockSpec((batch_tile, 1), lambda b: (b, 0)),     # time column
                pl.BlockSpec((_SUBLANE, d_pad), lambda b: (0, 0)),   # packed consts
            ],
            out_specs=pl.BlockSpec((batch_tile, d_pad), lambda b: (b, 0)),
        ),
        compiler_params=pltpu.CompilerParams(
            dimension_semantics=("parallel",)),
        cost_estimate=pl.CostEstimate(
            flops=3 * b_pad * d_pad,                 # 1 mul + 2 add per element
            transcendentals=b_pad * d_pad,           # single sin per element
            bytes_accessed=4 * (b_pad + _SUBLANE * d_pad + b_pad * d_pad)),
    )(t2, consts)

    if b_pad == B and d_pad == d:
        return out                                   # aligned fast path: no copy
    return out[:B, :d]


def _ref_forward(time, d):
    """Pure-JAX transliteration of the PyTorch forward (correctness check)."""
    i = jnp.arange(d)
    neg1_pow_i = jnp.where(i % 2 == 0, 1.0, -1.0)        # (-1) ** i
    even = 0.5 * (1.0 - neg1_pow_i)
    odd = 0.5 * (1.0 + neg1_pow_i)
    x = 1.0 / jnp.exp(math.log(10000.0) * ((i - i % 2).astype(jnp.float32) / d))
    x = time[:, None] * x[None, :]
    return jnp.sin(even * x) + jnp.cos(odd * x)


if __name__ == "__main__":
    key = jax.random.PRNGKey(0)

    # Case 1: lane/sublane-friendly shape (d multiple of 128).
    B, d = 2, 128
    time = jax.random.uniform(key, (B,), jnp.float32, minval=0.0, maxval=100.0)
    out = jax.block_until_ready(sinusoidal_position_embeddings(time, d))
    ref = _ref_forward(time, d)
    assert out.shape == (B, d)
    assert jnp.allclose(out, ref, atol=1e-4, rtol=1e-4), \
        f"max_err={float(jnp.max(jnp.abs(out - ref)))}"

    # Case 2: unaligned shape exercises the padding + slice path.
    B2, d2 = 10, 70
    time2 = jax.random.uniform(jax.random.PRNGKey(1), (B2,), jnp.float32,
                               minval=0.0, maxval=100.0)
    out2 = jax.block_until_ready(sinusoidal_position_embeddings(time2, d2))
    ref2 = _ref_forward(time2, d2)
    assert out2.shape == (B2, d2)
    assert jnp.allclose(out2, ref2, atol=1e-4, rtol=1e-4), \
        f"max_err={float(jnp.max(jnp.abs(out2 - ref2)))}"

    print("KERNEL_OK")
</pallas_src>

<mosaic_0001>
module attributes {stable_mosaic.version = 11 : i64} {
  func.func @_sinusoidal_kernel(%arg0: i32, %arg1: memref<8x1xf32, #tpu.memory_space<vmem>>, %arg2: memref<8x128xf32, #tpu.memory_space<vmem>>, %arg3: memref<8x128xf32, #tpu.memory_space<vmem>>) attributes {dimension_semantics = [#tpu.dimension_semantics<parallel>], iteration_bounds = array<i64: 1>, scalar_prefetch = 0 : i64, scratch_operands = 0 : i64, tpu.core_type = #tpu.core_type<tc>, window_params = [{transform_indices = @transform_0, window_bounds = array<i64: 8, 1>}, {pipeline_mode = #tpu.pipeline_mode<synchronous>, transform_indices = @transform_1, window_bounds = array<i64: 8, 128>}, {transform_indices = @transform_2, window_bounds = array<i64: 8, 128>}]} {
    %c0 = arith.constant 0 : index
    %c0_0 = arith.constant 0 : index
    %0 = vector.load %arg1[%c0, %c0_0] : memref<8x1xf32, #tpu.memory_space<vmem>>, vector<8x1xf32>
    %c0_1 = arith.constant 0 : index
    %c0_2 = arith.constant 0 : index
    %1 = vector.load %arg2[%c0_1, %c0_2] : memref<8x128xf32, #tpu.memory_space<vmem>>, vector<1x128xf32>
    %c1 = arith.constant 1 : index
    %c0_3 = arith.constant 0 : index
    %2 = vector.load %arg2[%c1, %c0_3] : memref<8x128xf32, #tpu.memory_space<vmem>>, vector<1x128xf32>
    %c2 = arith.constant 2 : index
    %c0_4 = arith.constant 0 : index
    %3 = vector.load %arg2[%c2, %c0_4] : memref<8x128xf32, #tpu.memory_space<vmem>>, vector<1x128xf32>
    %4 = vector.broadcast %0 : vector<8x1xf32> to vector<8x128xf32>
    %5 = vector.broadcast %1 : vector<1x128xf32> to vector<8x128xf32>
    %6 = arith.mulf %4, %5 : vector<8x128xf32>
    %7 = vector.broadcast %2 : vector<1x128xf32> to vector<8x128xf32>
    %8 = arith.addf %6, %7 : vector<8x128xf32>
    %9 = math.sin %8 : vector<8x128xf32>
    %10 = vector.broadcast %3 : vector<1x128xf32> to vector<8x128xf32>
    %11 = arith.addf %9, %10 : vector<8x128xf32>
    %c0_5 = arith.constant 0 : index
    %c0_6 = arith.constant 0 : index
    %12 = vector.load %arg3[%c0_5, %c0_6] : memref<8x128xf32, #tpu.memory_space<vmem>>, vector<8x128xf32>
    tpu.vector_store %arg3[%c0_5, %c0_6], %11 {strides = array<i32>} : memref<8x128xf32, #tpu.memory_space<vmem>>, vector<8x128xf32>,
    return
  }
  func.func @transform_0(%arg0: i32) -> (i32, i32) {
    %c0_i32 = arith.constant 0 : i32
    %c0_i32_0 = arith.constant 0 : i32
    return %arg0, %c0_i32 : i32, i32
  }
  func.func @transform_1(%arg0: i32) -> (i32, i32) {
    %c0_i32 = arith.constant 0 : i32
    %c0_i32_0 = arith.constant 0 : i32
    %c0_i32_1 = arith.constant 0 : i32
    return %c0_i32, %c0_i32_0 : i32, i32
  }
  func.func @transform_2(%arg0: i32) -> (i32, i32) {
    %c0_i32 = arith.constant 0 : i32
    %c0_i32_0 = arith.constant 0 : i32
    return %arg0, %c0_i32 : i32, i32
  }
}

</mosaic_0001>

<bundles_post_ra>
// kernel: tpu_custom_call.1
= control target key start
LH: loop header
LB: loop body
LE: loop exit
PB: predicated region body
PF: predicated region fallthrough
CT: control target
= control target key end

     0   :  { %v203_v1 = vmov 0   ;;  %s271_s0 = inlined_call_operand.vmem [shape: f32[8,1], index: 0, kind: input, shape index: {}]   ;;  %s272_s1 = inlined_call_operand.vmem [shape: f32[8,128], index: 1, kind: input, shape index: {}]   ;;  %s273_s2 = inlined_call_operand.hbm [shape: f32[8,128], index: 2, kind: output, shape index: {}]  }
   0x1   :  { %v12_v0 = vld [vmem:[%s271_s0] sm:$0xff]  ;;  %174 = vset.pattern.permute.xlu0 %v203_v1 }
   0x2   :  { %18 = vperm.xlu0 %174, %v12_v0  }
   0x3   :  { %7 = vsyncpa [#allocation3], 0  ;;  %v155_v2 = vld [vmem:[%s272_s1] ss:$0 sm:$0xff]  ;;  %v156_v3 = vld [vmem:[%s272_s1 + $0x1] ss:$0 sm:$0xff] }
   0x4   :  { %v204_v18 = vmov 2102212464   ;;  %v205_v20 = vmov 920167782   ;;  %v206_v24 = vmov 1326507024  }
   0x5   :  { %v207_v26 = vmov 683565275   ;;  %v208_v28 = vmov 2475754826   ;;  %v209_v31 = vmov 2131351028  }
   0x6   :  { %s210_s16 = smov [#allocation2]  }
   0x7   :  { %s147_s17 = sshll.u32 %s210_s16, 4  ;;  %s148_s17 = int_to_ptr.vmem [resolvable:$true] %s147_s17 }
   0x8   :  { %s179_s18 = scalar_lea.vmem %s148_s17, 128  ;;  %p184_p1 = scmp.lt.s32.totalorder %s148_s17, %s148_s17 }
   0x9   :  { %p180_p0 = scmp.ne.s32.totalorder %s148_s17, %s179_s18  ;;  %p185_p2 = scmp.lt.s32.totalorder %s179_s18, %s179_s18 }
   0xb   :  { %p186_p3 = por %p185_p2, %p184_p1 }
   0xd   :  { %p187_p4 = pnand %p186_p3, %p180_p0 }
  0x81   :  { %v19_v4 = vpop.permute.xlu0 %18 }
  0x82   :  { %v25_v5 = vmul.f32 %v155_v2, %v19_v4 }
  0x84   :  { %v235_v6 = vadd.f32 %v156_v3, %v25_v5 }
  0x86   :  { %v34_v7 = vand.u32 2139095040, %v235_v6  ;;  %v31_v8 = vand.u32 2147483647, %v235_v6  ;;  %vm33_vm7 = vcmp.lt.s32.totalorder %v235_v6, 0  ;;  %vm123_vm12 = vweird.f32 %v235_v6 }
  0x88   :  { %v35_v9 = vshrl.u32 %v34_v7, 23  ;;  %v38_v11 = vand.u32 8388607, %v31_v8  ;;  %vm32_vm8 = vcmp.le.f32.partialorder %v31_v8, 0.7853982 }
  0x89   :  { %v161_v8 = vld [vmem:[%s272_s1 + $0x2] ss:$0 sm:$0xff] }
  0x8a   :  { %v157_v10 = vadd.s32 4294967169, %v35_v9  ;;  %v39_v14 = vor.u32 8388608, %v38_v11 }
  0x8c   :  { %v41_v12 = vadd.s32 1, %v157_v10  ;;  %v79_v22 = vshll.u32 %v39_v14, 8 }
  0x8e   :  { %vm42_vm0 = vcmp.gt.s32.totalorder %v41_v12, 0 }
  0x8f   :  { %v43_v13 = vsel %vm42_vm0, %v41_v12, 0 }
  0x90   :  { %v45_v15 = vand.u32 31, %v43_v13  ;;  %v44_v16 = vshrl.u32 %v43_v13, 5 }
  0x92   :  { %v46_v17 = vsub.s32 32, %v45_v15  ;;  %v57_v19 = vshll.u32 %v204_v18, %v45_v15  ;;  %v60_v21 = vshll.u32 %v205_v20, %v45_v15  ;;  %v48_v27 = vshll.u32 %v207_v26, %v45_v15 }
  0x93   :  { %v51_v30 = vshll.u32 %v208_v28, %v45_v15  ;;  %v54_v33 = vshll.u32 %v209_v31, %v45_v15  ;;  %vm66_vm1 = vcmp.lt.s32.totalorder %v44_v16, 4  ;;  %vm63_vm2 = vcmp.lt.s32.totalorder %v44_v16, 1 }
  0x94   :  { %v58_v23 = vshrl.u32 %v205_v20, %v46_v17  ;;  %v61_v25 = vshrl.u32 %v206_v24, %v46_v17  ;;  %v49_v29 = vshrl.u32 %v208_v28, %v46_v17  ;;  %v52_v32 = vshrl.u32 %v209_v31, %v46_v17 }
  0x95   :  { %v55_v34 = vshrl.u32 %v204_v18, %v46_v17  ;;  %v47_v38 = vshrl.u32 %v207_v26, %v46_v17  ;;  %vm64_vm3 = vcmp.lt.s32.totalorder %v44_v16, 2  ;;  %vm65_vm4 = vcmp.lt.s32.totalorder %v44_v16, 3 }
  0x96   :  { %v59_v35 = vor.u32 %v58_v23, %v57_v19  ;;  %v62_v36 = vor.u32 %v61_v25, %v60_v21  ;;  %v50_v37 = vor.u32 %v49_v29, %v48_v27  ;;  %v53_v39 = vor.u32 %v52_v32, %v51_v30 }
  0x97   :  { %v56_v40 = vor.u32 %v55_v34, %v54_v33 }
  0x98   :  { %v72_v41 = vsel %vm66_vm1, %v59_v35, 920167782  ;;  %v76_v42 = vsel %vm66_vm1, %v62_v36, 1326507024  ;;  %v71_v44 = vsel %vm63_vm2, %v50_v37, %v53_v39  ;;  %v67_v47 = vsel %vm63_vm2, %v47_v38, %v50_v37 }
  0x99   :  { %v68_v43 = vsel %vm66_vm1, %v56_v40, 2102212464  ;;  %v73_v45 = vsel %vm65_vm4, %v56_v40, %v72_v41  ;;  %v75_v46 = vsel %vm63_vm2, %v53_v39, %v56_v40  ;;  %v77_v50 = vsel %vm65_vm4, %v59_v35, %v76_v42 }
  0x9a   :  { %v69_v48 = vsel %vm65_vm4, %v53_v39, %v68_v43  ;;  %v74_v49 = vsel %vm64_vm3, %v71_v44, %v73_v45  ;;  %v78_v51 = vsel %vm64_vm3, %v75_v46, %v77_v50 }
  0x9b   :  { %v241_v52 = vmul.u32.u64.low %v79_v22, %v74_v49  ;;  %v242_v53 = vmul.u32.u64.high %v79_v22, %v74_v49, %v241_v52  ;;  %v244_v54 = vmul.u32.u64.low %v79_v22, %v78_v51  ;;  %v245_v55 = vmul.u32.u64.high %v79_v22, %v78_v51, %v244_v54 }
  0x9c   :  { %v70_v56 = vsel %vm64_vm3, %v67_v47, %v69_v48 }
  0x9d   :  { %v89_v57 = vadd.s32 1, %v242_v53  ;;  %v86_v58 = vmul.u32 %v79_v22, %v70_v56  ;;  %vm88_vm5 = vc.u32 %v245_v55, %v241_v52  ;;  %v87_v7 = vadd.s32 %v241_v52, %v245_v55 }
  0x9f   :  { %v90_v59 = vsel %vm88_vm5, %v89_v57, %v242_v53 }
  0xa0   :  { %v91_v60 = vadd.s32 %v90_v59, %v86_v58 }
  0xa2   :  { %v92_v61 = vadd.s32 536870912, %v91_v60 }
  0xa4   :  { %v93_v62 = vshrl.u32 %v92_v61, 30 }
  0xa6   :  { %v94_v63 = vshll.u32 %v93_v62, 30  ;;  %v117_v20 = vsub.s32 4, %v93_v62 }
  0xa8   :  { %v95_v0 = vsub.s32 %v91_v60, %v94_v63  ;;  %v118_v23 = vsel %vm33_vm7, %v117_v20, %v93_v62 }
  0xa9   :  { %v120_v25 = vsel %vm32_vm8, 0, %v118_v23 }
  0xaa   :  { %v97_v1 = vsub.s32 0, %v95_v0  ;;  %v124_v26 = vadd.s32 3, %v120_v25 }
  0xac   :  { %v158_v2 = vmin.u32 %v97_v1, %v95_v0  ;;  %v125_v27 = vand.u32 3, %v124_v26 }
  0xae   :  { %v99_v3 = vclz %v158_v2  ;;  %vm130_vm9 = vcmp.eq.s32.totalorder %v125_v27, 2  ;;  %vm127_vm10 = vcmp.eq.s32.totalorder %v125_v27, 0  ;;  %vm126_vm11 = vcmp.lt.s32.totalorder %v125_v27, 2 }
  0xb0   :  { %v159_v4 = vadd.s32 4294967294, %v99_v3 }
  0xb2   :  { %vm160_vm6 = vcmp.lt.s32.totalorder %v159_v4, 0 }
  0xb3   :  { %v102_v5 = vsel %vm160_vm6, 0, %v159_v4 }
  0xb4   :  { %v103_v9 = vsub.s32 32, %v102_v5  ;;  %v107_v10 = vsub.s32 4294967266, %v102_v5  ;;  %v104_v11 = vshll.u32 %v95_v0, %v102_v5 }
  0xb6   :  { %v105_v12 = vshrl.u32 %v87_v7, %v103_v9  ;;  %v108_v13 = vadd.s32 127, %v107_v10 }
  0xb8   :  { %v106_v14 = vor.u32 %v105_v12, %v104_v11  ;;  %v109_v15 = vshll.u32 %v108_v13, 23 }
  0xba   :  { %v110_v16 = vor.u32 4788187, %v109_v15  ;;  %v113_v18 = vcvt.s32.f32 %v106_v14 }
  0xbc   :  { %v111_v17 = vand.u32 2147483647, %v110_v16 }
  0xbe   :  { %v114_v19 = vmul.f32 %v113_v18, %v111_v17 }
  0xc0   :  { %v115_v21 = vxor.u32 2147483648, %v114_v19 }
  0xc2   :  { %v116_v22 = vsel %vm33_vm7, %v115_v21, %v114_v19 }
  0xc3   :  { %v119_v24 = vsel %vm32_vm8, %v235_v6, %v116_v22 }
  0xc4   :  { %175 = vcosq.f32 %v119_v24 }
  0xc5   :  { %177 = vsinq.f32 %v119_v24 }
  0xce   :  { %v176_v28 = vpop.eup %175 }
  0xcf   :  { %v178_v29 = vpop.eup %177  ;;  %v131_v30 = vxor.u32 2147483648, %v176_v28 }
  0xd0   :  { %v128_v31 = vxor.u32 2147483648, %v178_v29 }
  0xd1   :  { %v132_v32 = vsel %vm130_vm9, %v131_v30, %v178_v29 }
  0xd2   :  { %v129_v33 = vsel %vm127_vm10, %v176_v28, %v128_v31 }
  0xd3   :  { %v133_v34 = vsel %vm126_vm11, %v129_v33, %v132_v32 }
  0xd4   :  { %v134_v35 = vsel %vm123_vm12, nan, %v133_v34 }
  0xd5   :  { %v139_v36 = vadd.f32 %v161_v8, %v134_v35 }
  0xd7   :  { %140 = vst [vmem:[#allocation2] sm:$0xff] %v139_v36 }
  0xd8   :  { %190 = shalt.err (!%p187_p4)
}
  0xd9   :  { %s191_s20 = scalar_lea.hbm %s273_s2, 128 }
  0xda   :  { %p192_p5 = scmp.ne.s32.totalorder %s273_s2, %s191_s20  ;;  %p195_p6 = scmp.lt.u32.totalorder %s191_s20, %s273_s2 }
  0xdc   :  { %p197_p7 = pnand %p195_p6, %p192_p5 }
  0xde   :  { %200 = shalt.err (!%p197_p7)
}
  0xdf   :  { %150 = dma.vmem_to_hbm [thread:$0]  %s148_s17, 128, %s273_s2, [#allocation3]  }
  0xe0   :  { %201 = dma.done.wait [#allocation3], 128  }
  0xe1   :  { %202 = vsyncadd [#allocation3], 4294967168 }
  0xe2   :  { %154 = vsyncpa [#allocation3], 1 }

</bundles_post_ra>
